<compile_context>
chip_gen: v7x
topology: tpu7x:2x2x1
jax: 0.10.0
libtpu: 0.0.40
codegen_flags: <defaults>
</compile_context>

<pallas_src>
import functools
import math

import jax
import jax.numpy as jnp
from jax import lax
from jax.experimental import pallas as pl
from jax.experimental.pallas import tpu as pltpu


def _semantic_attention_kernel(q_ref, kv_ref, wcat_ref, bcat_ref, o_ref,
                               *, N, L, S, E):
    # q_ref:    (L*N, E)  query rows, l-major / n-minor (free reshape of (L,N,E))
    # kv_ref:   (S*N, E)  key/value rows, s-major / n-minor
    # wcat_ref: (E, 4E)   packed [wq*scale | wk | wv | wo], all pre-transposed
    # bcat_ref: (1, 2E)   packed [bq*scale | bo + bv @ wo]
    f32 = jnp.float32
    q_in = q_ref[...].astype(f32)                       # (L*N, E)
    kv_in = kv_ref[...].astype(f32)                     # (S*N, E)

    wq = wcat_ref[:, 0 * E:1 * E]
    wk = wcat_ref[:, 1 * E:2 * E]
    wv = wcat_ref[:, 2 * E:3 * E]
    wo = wcat_ref[:, 3 * E:4 * E]
    bq = bcat_ref[:, 0:E]                               # (1, E)
    bo = bcat_ref[:, E:2 * E]                           # (1, E)

    # Projections. bk dropped (softmax-invariant); bv folded into bo.
    q = jnp.dot(q_in, wq, preferred_element_type=f32) + bq     # (L*N, E)
    k = jnp.dot(kv_in, wk, preferred_element_type=f32)         # (S*N, E)
    v = jnp.dot(kv_in, wv, preferred_element_type=f32)         # (S*N, E)

    # One flat score matmul; block-diagonal mask keeps batches independent.
    scores = lax.dot_general(q, k, (((1,), (1,)), ((), ())),
                             preferred_element_type=f32)       # (L*N, S*N)
    row_b = lax.broadcasted_iota(jnp.int32, (L * N, S * N), 0) % N
    col_b = lax.broadcasted_iota(jnp.int32, (L * N, S * N), 1) % N
    scores = jnp.where(row_b == col_b, scores, jnp.float32(-1e30))

    # Numerically-stable softmax over the key axis.
    m = jnp.max(scores, axis=-1, keepdims=True)
    e = jnp.exp(scores - m)
    denom = jnp.sum(e, axis=-1, keepdims=True)
    attn = e * pl.reciprocal(denom, approx=True)               # EUP vrcp

    ctx = jnp.dot(attn, v, preferred_element_type=f32)         # (L*N, E)
    out = jnp.dot(ctx, wo, preferred_element_type=f32) + bo
    o_ref[...] = out.astype(o_ref.dtype)                       # (L*N, E)


def semantic_attention(semantic_embeddings, position_embedding, prepared):
    """
    semantic_embeddings: (S, N, E)  key/value (PyTorch seq-first layout)
    position_embedding:  (L, N, E)  query
    returns attn_output: (L, N, E)
    """
    wcat, bcat = prepared
    L, N, E = position_embedding.shape
    S = semantic_embeddings.shape[0]

    # Free row-major views (no transposes, no data movement).
    q_flat = position_embedding.reshape(L * N, E)
    kv_flat = semantic_embeddings.reshape(S * N, E)

    def full(shape):
        return pl.BlockSpec(shape, lambda i: (0, 0))

    kernel = functools.partial(_semantic_attention_kernel, N=N, L=L, S=S, E=E)

    out_flat = pl.pallas_call(
        kernel,
        out_shape=jax.ShapeDtypeStruct((L * N, E), position_embedding.dtype),
        grid_spec=pltpu.PrefetchScalarGridSpec(
            num_scalar_prefetch=0,
            grid=(1,),                                   # single invocation
            in_specs=[
                full((L * N, E)),      # query rows
                full((S * N, E)),      # key/value rows
                full((E, 4 * E)),      # packed weights (lane-dense, 128 wide)
                full((1, 2 * E)),      # packed biases
            ],
            out_specs=full((L * N, E)),
        ),
        compiler_params=pltpu.CompilerParams(
            dimension_semantics=("arbitrary",)),
    )(q_flat, kv_flat, wcat, bcat)

    # (L*N, E) -> (L, N, E): free reshape, row order already l-major/n-minor.
    return out_flat.reshape(L, N, E)


def init_params(key, E):
    """PyTorch nn.MultiheadAttention-shaped params:
       in_proj_weight (3E, E), in_proj_bias (3E,), out_proj W (E, E), b (E,)."""
    k1, k2, k3 = jax.random.split(key, 3)
    in_proj_w = jax.random.normal(k1, (3 * E, E), jnp.float32) * 0.05
    in_proj_b = jax.random.normal(k2, (3 * E,), jnp.float32) * 0.05
    out_w = jax.random.normal(k3, (E, E), jnp.float32) * 0.05
    out_b = jnp.zeros((E,), jnp.float32)
    return in_proj_w, in_proj_b, out_w, out_b


def prepare_params(in_proj_w, in_proj_b, out_w, out_b):
    """One-time fold/fuse of the raw PyTorch params for the kernel:
       - 1/sqrt(E) query scale folded into wq / bq,
       - K bias dropped (softmax-invariant), V bias folded into output bias
         (bo' = bo + bv @ out_w.T; exact since attention rows sum to 1),
       - all four weight matrices pre-transposed and packed into one
         lane-dense (E, 4E) slab, both remaining biases into one (1, 2E) row."""
    E = out_w.shape[0]
    scale = 1.0 / math.sqrt(E)
    wq, wk, wv = in_proj_w[:E], in_proj_w[E:2 * E], in_proj_w[2 * E:]
    bq, bv = in_proj_b[:E], in_proj_b[2 * E:]

    wcat = jnp.concatenate([(wq * scale).T, wk.T, wv.T, out_w.T], axis=1)  # (E, 4E)
    bo_folded = out_b + bv @ out_w.T
    bcat = jnp.concatenate([bq * scale, bo_folded]).reshape(1, 2 * E)      # (1, 2E)
    return wcat, bcat


def _reference(sem, pos, raw_params):
    """Pure-JAX reference of PyTorch single-head MultiheadAttention forward."""
    in_proj_w, in_proj_b, out_w, out_b = raw_params
    E = pos.shape[-1]
    wq, wk, wv = in_proj_w[:E], in_proj_w[E:2 * E], in_proj_w[2 * E:]
    bq, bk, bv = in_proj_b[:E], in_proj_b[E:2 * E], in_proj_b[2 * E:]
    q = pos @ wq.T + bq            # (L, N, E)
    k = sem @ wk.T + bk            # (S, N, E)
    v = sem @ wv.T + bv            # (S, N, E)
    scale = 1.0 / math.sqrt(E)
    scores = jnp.einsum('lne,sne->nls', q * scale, k)
    attn = jax.nn.softmax(scores, axis=-1)
    ctx = jnp.einsum('nls,sne->lne', attn, v)
    return ctx @ out_w.T + out_b


if __name__ == "__main__":
    key = jax.random.PRNGKey(0)
    k_sem, k_pos, k_par = jax.random.split(key, 3)

    E = 32   # embedding_dim
    N = 2    # batch
    S = 8    # number of semantic embeddings (key/value seq len)
    L = 8    # number of position embeddings (query seq len)

    semantic_embeddings = jax.random.normal(k_sem, (S, N, E), jnp.float32)
    position_embedding = jax.random.normal(k_pos, (L, N, E), jnp.float32)

    raw_params = init_params(k_par, E)
    prepared = prepare_params(*raw_params)

    out = semantic_attention(semantic_embeddings, position_embedding, prepared)
    out = jax.block_until_ready(out)

    ref = _reference(semantic_embeddings, position_embedding, raw_params)
    assert out.shape == (L, N, E)
    # approx=True reciprocal => ~1e-3 relative error in attention weights.
    assert jnp.allclose(out, ref, atol=2e-3, rtol=2e-3), "mismatch vs reference"

    print("KERNEL_OK")
</pallas_src>

<mosaic_0001>
module attributes {stable_mosaic.version = 11 : i64} {
  func.func @_semantic_attention_kernel(%arg0: i32, %arg1: memref<16x32xf32, #tpu.memory_space<vmem>>, %arg2: memref<16x32xf32, #tpu.memory_space<vmem>>, %arg3: memref<32x128xf32, #tpu.memory_space<vmem>>, %arg4: memref<1x64xf32, #tpu.memory_space<vmem>>, %arg5: memref<16x32xf32, #tpu.memory_space<vmem>>) attributes {dimension_semantics = [#tpu.dimension_semantics<arbitrary>], iteration_bounds = array<i64: 1>, scalar_prefetch = 0 : i64, scratch_operands = 0 : i64, tpu.core_type = #tpu.core_type<tc>, window_params = [{pipeline_mode = #tpu.pipeline_mode<synchronous>, transform_indices = @transform_0, window_bounds = array<i64: 16, 32>}, {pipeline_mode = #tpu.pipeline_mode<synchronous>, transform_indices = @transform_1, window_bounds = array<i64: 16, 32>}, {pipeline_mode = #tpu.pipeline_mode<synchronous>, transform_indices = @transform_2, window_bounds = array<i64: 32, 128>}, {pipeline_mode = #tpu.pipeline_mode<synchronous>, transform_indices = @transform_3, window_bounds = array<i64: 1, 64>}, {pipeline_mode = #tpu.pipeline_mode<synchronous>, transform_indices = @transform_4, window_bounds = array<i64: 16, 32>}]} {
    %c0 = arith.constant 0 : index
    %c0_0 = arith.constant 0 : index
    %0 = vector.load %arg1[%c0, %c0_0] : memref<16x32xf32, #tpu.memory_space<vmem>>, vector<16x32xf32>
    %c0_1 = arith.constant 0 : index
    %c0_2 = arith.constant 0 : index
    %1 = vector.load %arg2[%c0_1, %c0_2] : memref<16x32xf32, #tpu.memory_space<vmem>>, vector<16x32xf32>
    %c0_3 = arith.constant 0 : index
    %c0_4 = arith.constant 0 : index
    %2 = vector.load %arg3[%c0_3, %c0_4] : memref<32x128xf32, #tpu.memory_space<vmem>>, vector<32x32xf32>
    %c0_5 = arith.constant 0 : index
    %c32 = arith.constant 32 : index
    %3 = vector.load %arg3[%c0_5, %c32] : memref<32x128xf32, #tpu.memory_space<vmem>>, vector<32x32xf32>
    %c0_6 = arith.constant 0 : index
    %c64 = arith.constant 64 : index
    %4 = vector.load %arg3[%c0_6, %c64] : memref<32x128xf32, #tpu.memory_space<vmem>>, vector<32x32xf32>
    %c0_7 = arith.constant 0 : index
    %c96 = arith.constant 96 : index
    %5 = vector.load %arg3[%c0_7, %c96] : memref<32x128xf32, #tpu.memory_space<vmem>>, vector<32x32xf32>
    %c0_8 = arith.constant 0 : index
    %c0_9 = arith.constant 0 : index
    %6 = vector.load %arg4[%c0_8, %c0_9] : memref<1x64xf32, #tpu.memory_space<vmem>>, vector<1x32xf32>
    %c0_10 = arith.constant 0 : index
    %c32_11 = arith.constant 32 : index
    %7 = vector.load %arg4[%c0_10, %c32_11] : memref<1x64xf32, #tpu.memory_space<vmem>>, vector<1x32xf32>
    %cst = arith.constant dense<0.000000e+00> : vector<16x32xf32>
    %8 = tpu.matmul %0, %2, %cst {dimension_numbers = #tpu.dot_dimension_numbers<[1], [0], [0], [1], [0, 0, 1, 1], [], []>} : vector<16x32xf32>, vector<32x32xf32>, vector<16x32xf32> -> vector<16x32xf32>
    %9 = vector.broadcast %6 : vector<1x32xf32> to vector<16x32xf32>
    %10 = arith.addf %8, %9 : vector<16x32xf32>
    %cst_12 = arith.constant dense<0.000000e+00> : vector<16x32xf32>
    %11 = tpu.matmul %1, %3, %cst_12 {dimension_numbers = #tpu.dot_dimension_numbers<[1], [0], [0], [1], [0, 0, 1, 1], [], []>} : vector<16x32xf32>, vector<32x32xf32>, vector<16x32xf32> -> vector<16x32xf32>
    %cst_13 = arith.constant dense<0.000000e+00> : vector<16x32xf32>
    %12 = tpu.matmul %1, %4, %cst_13 {dimension_numbers = #tpu.dot_dimension_numbers<[1], [0], [0], [1], [0, 0, 1, 1], [], []>} : vector<16x32xf32>, vector<32x32xf32>, vector<16x32xf32> -> vector<16x32xf32>
    %cst_14 = arith.constant dense<0.000000e+00> : vector<16x16xf32>
    %13 = tpu.matmul %10, %11, %cst_14 {dimension_numbers = #tpu.dot_dimension_numbers<[1], [1], [0], [0], [0, 0, 1, 0], [], []>} : vector<16x32xf32>, vector<16x32xf32>, vector<16x16xf32> -> vector<16x16xf32>
    %14 = tpu.iota {dimensions = array<i32: 0>} : vector<16x16xi32>
    %c2_i32 = arith.constant 2 : i32
    %c0_i32 = arith.constant 0 : i32
    %15 = arith.cmpi eq, %c2_i32, %c0_i32 : i32
    %c1_i32 = arith.constant 1 : i32
    %16 = arith.select %15, %c1_i32, %c2_i32 : i32
    %17 = vector.broadcast %16 : i32 to vector<16x16xi32>
    %18 = arith.remsi %14, %17 : vector<16x16xi32>
    %c0_i32_15 = arith.constant 0 : i32
    %19 = vector.broadcast %c0_i32_15 : i32 to vector<16x16xi32>
    %20 = arith.cmpi ne, %18, %19 : vector<16x16xi32>
    %c0_i32_16 = arith.constant 0 : i32
    %21 = vector.broadcast %c0_i32_16 : i32 to vector<16x16xi32>
    %22 = arith.cmpi slt, %18, %21 : vector<16x16xi32>
    %c0_i32_17 = arith.constant 0 : i32
    %23 = arith.cmpi slt, %16, %c0_i32_17 : i32
    %24 = vector.broadcast %23 : i1 to vector<16x16xi1>
    %25 = vector.broadcast %24 : vector<16x16xi1> to vector<16x16xi1>
    %26 = arith.xori %22, %25 : vector<16x16xi1>
    %27 = arith.andi %26, %20 : vector<16x16xi1>
    %28 = vector.broadcast %16 : i32 to vector<16x16xi32>
    %29 = arith.addi %18, %28 : vector<16x16xi32>
    %30 = arith.select %27, %29, %18 : vector<16x16xi1>, vector<16x16xi32>
    %31 = tpu.iota {dimensions = array<i32: 1>} : vector<16x16xi32>
    %c2_i32_18 = arith.constant 2 : i32
    %c0_i32_19 = arith.constant 0 : i32
    %32 = arith.cmpi eq, %c2_i32_18, %c0_i32_19 : i32
    %c1_i32_20 = arith.constant 1 : i32
    %33 = arith.select %32, %c1_i32_20, %c2_i32_18 : i32
    %34 = vector.broadcast %33 : i32 to vector<16x16xi32>
    %35 = arith.remsi %31, %34 : vector<16x16xi32>
    %c0_i32_21 = arith.constant 0 : i32
    %36 = vector.broadcast %c0_i32_21 : i32 to vector<16x16xi32>
    %37 = arith.cmpi ne, %35, %36 : vector<16x16xi32>
    %c0_i32_22 = arith.constant 0 : i32
    %38 = vector.broadcast %c0_i32_22 : i32 to vector<16x16xi32>
    %39 = arith.cmpi slt, %35, %38 : vector<16x16xi32>
    %c0_i32_23 = arith.constant 0 : i32
    %40 = arith.cmpi slt, %33, %c0_i32_23 : i32
    %41 = vector.broadcast %40 : i1 to vector<16x16xi1>
    %42 = vector.broadcast %41 : vector<16x16xi1> to vector<16x16xi1>
    %43 = arith.xori %39, %42 : vector<16x16xi1>
    %44 = arith.andi %43, %37 : vector<16x16xi1>
    %45 = vector.broadcast %33 : i32 to vector<16x16xi32>
    %46 = arith.addi %35, %45 : vector<16x16xi32>
    %47 = arith.select %44, %46, %35 : vector<16x16xi1>, vector<16x16xi32>
    %48 = arith.cmpi eq, %30, %47 : vector<16x16xi32>
    %cst_24 = arith.constant -1.000000e+30 : f32
    %49 = vector.broadcast %cst_24 : f32 to vector<16x16xf32>
    %50 = arith.select %48, %13, %49 : vector<16x16xi1>, vector<16x16xf32>
    %cst_25 = arith.constant dense<0xFF800000> : vector<16xf32>
    %51 = vector.multi_reduction <maximumf>, %50, %cst_25 [1] : vector<16x16xf32> to vector<16xf32>
    %52 = vector.shape_cast %51 : vector<16xf32> to vector<16x1xf32>
    %53 = vector.broadcast %52 : vector<16x1xf32> to vector<16x16xf32>
    %54 = arith.subf %50, %53 : vector<16x16xf32>
    %55 = math.exp %54 : vector<16x16xf32>
    %cst_26 = arith.constant dense<0.000000e+00> : vector<16xf32>
    %56 = vector.multi_reduction <add>, %55, %cst_26 [1] : vector<16x16xf32> to vector<16xf32>
    %57 = vector.shape_cast %56 : vector<16xf32> to vector<16x1xf32>
    %58 = tpu.reciprocal %57 {approx = true} : vector<16x1xf32> -> vector<16x1xf32>
    %59 = vector.broadcast %58 : vector<16x1xf32> to vector<16x16xf32>
    %60 = arith.mulf %55, %59 : vector<16x16xf32>
    %cst_27 = arith.constant dense<0.000000e+00> : vector<16x32xf32>
    %61 = tpu.matmul %60, %12, %cst_27 {dimension_numbers = #tpu.dot_dimension_numbers<[1], [0], [0], [1], [0, 0, 1, 1], [], []>} : vector<16x16xf32>, vector<16x32xf32>, vector<16x32xf32> -> vector<16x32xf32>
    %cst_28 = arith.constant dense<0.000000e+00> : vector<16x32xf32>
    %62 = tpu.matmul %61, %5, %cst_28 {dimension_numbers = #tpu.dot_dimension_numbers<[1], [0], [0], [1], [0, 0, 1, 1], [], []>} : vector<16x32xf32>, vector<32x32xf32>, vector<16x32xf32> -> vector<16x32xf32>
    %63 = vector.broadcast %7 : vector<1x32xf32> to vector<16x32xf32>
    %64 = arith.addf %62, %63 : vector<16x32xf32>
    %c0_29 = arith.constant 0 : index
    %c0_30 = arith.constant 0 : index
    %65 = vector.load %arg5[%c0_29, %c0_30] : memref<16x32xf32, #tpu.memory_space<vmem>>, vector<16x32xf32>
    tpu.vector_store %arg5[%c0_29, %c0_30], %64 {strides = array<i32>} : memref<16x32xf32, #tpu.memory_space<vmem>>, vector<16x32xf32>,
    return
  }
  func.func @transform_0(%arg0: i32) -> (i32, i32) {
    %c0_i32 = arith.constant 0 : i32
    %c0_i32_0 = arith.constant 0 : i32
    %c0_i32_1 = arith.constant 0 : i32
    return %c0_i32, %c0_i32_0 : i32, i32
  }
  func.func @transform_1(%arg0: i32) -> (i32, i32) {
    %c0_i32 = arith.constant 0 : i32
    %c0_i32_0 = arith.constant 0 : i32
    %c0_i32_1 = arith.constant 0 : i32
    return %c0_i32, %c0_i32_0 : i32, i32
  }
  func.func @transform_2(%arg0: i32) -> (i32, i32) {
    %c0_i32 = arith.constant 0 : i32
    %c0_i32_0 = arith.constant 0 : i32
    %c0_i32_1 = arith.constant 0 : i32
    return %c0_i32, %c0_i32_0 : i32, i32
  }
  func.func @transform_3(%arg0: i32) -> (i32, i32) {
    %c0_i32 = arith.constant 0 : i32
    %c0_i32_0 = arith.constant 0 : i32
    %c0_i32_1 = arith.constant 0 : i32
    return %c0_i32, %c0_i32_0 : i32, i32
  }
  func.func @transform_4(%arg0: i32) -> (i32, i32) {
    %c0_i32 = arith.constant 0 : i32
    %c0_i32_0 = arith.constant 0 : i32
    %c0_i32_1 = arith.constant 0 : i32
    return %c0_i32, %c0_i32_0 : i32, i32
  }
}

</mosaic_0001>

<bundles_post_ra>
// kernel: tpu_custom_call.1
= control target key start
LH: loop header
LB: loop body
LE: loop exit
PB: predicated region body
PF: predicated region fallthrough
CT: control target
= control target key end

     0   :  { %9 = vsyncpa [#allocation3], 0  ;;  %s1122_s0 = inlined_call_operand.hbm [shape: f32[16,32], index: 0, kind: input, shape index: {}]   ;;  %s1123_s1 = inlined_call_operand.hbm [shape: f32[16,32], index: 1, kind: input, shape index: {}]   ;;  %s1124_s2 = inlined_call_operand.hbm [shape: f32[32,128], index: 2, kind: input, shape index: {}]   ;;  %s1125_s3 = inlined_call_operand.vmem [shape: f32[1,64], index: 3, kind: input, shape index: {}]   ;;  %s1126_s4 = inlined_call_operand.hbm [shape: f32[16,32], index: 4, kind: output, shape index: {}]  }
   0x1   :  { %10 = vsyncpa [#allocation6], 0 }
   0x2   :  { %11 = vsyncpa [#allocation4], 0  ;;  %s980_s15 = smov [#allocation5]   ;;  %s981_s17 = smov [#allocation2]  }
   0x3   :  { %s29_s16 = sshll.u32 %s980_s15, 4  ;;  %s17_s18 = sshll.u32 %s981_s17, 4  ;;  %s30_s16 = int_to_ptr.vmem [resolvable:$true] %s29_s16  ;;  %s1014_s18 = int_to_ptr.vmem [resolvable:$true] %s17_s18 }
   0x4   :  { %s886_s21 = scalar_lea.hbm %s1123_s1, 256 }
   0x5   :  { %p887_p0 = scmp.ne.s32.totalorder %s1123_s1, %s886_s21  ;;  %p890_p1 = scmp.lt.u32.totalorder %s886_s21, %s1123_s1 }
   0x7   :  { %p892_p2 = pnand %p890_p1, %p887_p0 }
   0x9   :  { %895 = shalt.err (!%p892_p2)
}
   0xa   :  { %s896_s26 = scalar_lea.vmem %s30_s16, 256  ;;  %p901_p4 = scmp.lt.s32.totalorder %s30_s16, %s30_s16 }
   0xb   :  { %p897_p3 = scmp.ne.s32.totalorder %s30_s16, %s896_s26  ;;  %p902_p5 = scmp.lt.s32.totalorder %s896_s26, %s896_s26 }
   0xd   :  { %p903_p6 = por %p902_p5, %p901_p4 }
   0xf   :  { %p904_p7 = pnand %p903_p6, %p897_p3 }
  0x11   :  { %907 = shalt.err (!%p904_p7)
}
  0x12   :  { %s982_s27 = smov 128   ;;  %s983_s28 = smov 8  }
  0x13   :  { %35 = dma.hbm_to_vmem [thread:$0]  %s1123_s1, 256, %s30_s16, [#allocation6], %s982_s27, %s982_s27, %s983_s28  }
  0x14   :  { %s908_s7 = scalar_lea.hbm %s1122_s0, 256 }
  0x15   :  { %p909_p8 = scmp.ne.s32.totalorder %s1122_s0, %s908_s7  ;;  %p912_p9 = scmp.lt.u32.totalorder %s908_s7, %s1122_s0 }
  0x17   :  { %p914_p10 = pnand %p912_p9, %p909_p8 }
  0x19   :  { %917 = shalt.err (!%p914_p10)
}
  0x1a   :  { %s918_s12 = scalar_lea.vmem %s1014_s18, 256  ;;  %p923_p12 = scmp.lt.s32.totalorder %s1014_s18, %s1014_s18 }
  0x1b   :  { %p919_p11 = scmp.ne.s32.totalorder %s1014_s18, %s918_s12  ;;  %p924_p13 = scmp.lt.s32.totalorder %s918_s12, %s918_s12 }
  0x1d   :  { %p925_p0 = por %p924_p13, %p923_p12 }
  0x1f   :  { %p926_p1 = pnand %p925_p0, %p919_p11 }
  0x21   :  { %929 = shalt.err (!%p926_p1)
}
  0x22   :  { %23 = dma.hbm_to_vmem [thread:$0]  %s1122_s0, 256, %s1014_s18, [#allocation3], %s982_s27, %s982_s27, %s983_s28  }
  0x23   :  { %s984_s14 = smov [#allocation7]   ;;  %s930_s19 = scalar_lea.hbm %s1124_s2, 512 }
  0x24   :  { %s41_s15 = sshll.u32 %s984_s14, 4  ;;  %p931_p2 = scmp.ne.s32.totalorder %s1124_s2, %s930_s19  ;;  %s42_s15 = int_to_ptr.vmem [resolvable:$true] %s41_s15 }
  0x25   :  { %p934_p3 = scmp.lt.u32.totalorder %s930_s19, %s1124_s2 }
  0x27   :  { %p936_p4 = pnand %p934_p3, %p931_p2 }
  0x29   :  { %939 = shalt.err (!%p936_p4)
}
  0x2a   :  { %s940_s24 = scalar_lea.vmem %s42_s15, 512  ;;  %p945_p6 = scmp.lt.s32.totalorder %s42_s15, %s42_s15 }
  0x2b   :  { %p941_p5 = scmp.ne.s32.totalorder %s42_s15, %s940_s24  ;;  %p946_p7 = scmp.lt.s32.totalorder %s940_s24, %s940_s24 }
  0x2d   :  { %p947_p8 = por %p946_p7, %p945_p6 }
  0x2f   :  { %p948_p9 = pnand %p947_p8, %p941_p5 }
  0x31   :  { %951 = shalt.err (!%p948_p9)
}
  0x32   :  { %47 = dma.hbm_to_vmem [thread:$0]  %s1124_s2, 512, %s42_s15, [#allocation6], %s982_s27, %s982_s27, %s983_s28  }
  0x33   :  { %974 = dma.done.wait [#allocation3], 256  }
  0x34   :  { %975 = vsyncadd [#allocation3], 4294967040 }
  0x35   :  { %976 = dma.done.wait [#allocation6], 768  }
  0x36   :  { %977 = vsyncadd [#allocation6], 4294966528  ;;  %vm74_vm0 = vcmask 261120   ;;  %v63_v0 = vld [vmem:[#allocation7] sm:$0xff]  ;;  %v64_v1 = vld [vmem:[#allocation7 + $0x8] sm:$0xff]  ;;  %s985_s25 = smov 96   ;;  %v427_v36 = vlaneseq }
  0x37   :  { %v65_v2 = vld [vmem:[#allocation7 + $0x10] sm:$0xff]  ;;  %v1066_v3 = vpack.i.bf16 %v64_v1, %v63_v0  ;;  %v66_v4 = vld [vmem:[#allocation7 + $0x18] sm:$0xff]  ;;  %v797_v5 = vpack.c.bf16 %v64_v1, %v63_v0  ;;  %v59_v8 = vld [vmem:[#allocation2] sm:$0xff]  ;;  %s986_s29 = smov 64   ;;  %vm472_vm4 = vcmask 130048   ;;  %s988_s30 = smov [#allocation8]  }
  0x38   :  { %v61_v6 = vld [vmem:[#allocation5] sm:$0xff]  ;;  %v801_v7 = vpack.c.bf16 %v66_v4, %v65_v2  ;;  %v1071_v9 = vpack.i.bf16 %v66_v4, %v65_v2  ;;  %747 = vmatprep.mubr.msk.f32.mxu0 %vm74_vm0, %v59_v8  ;;  %v60_v10 = vld [vmem:[#allocation2 + $0x8] sm:$0xff]  ;;  %v62_v19 = vld [vmem:[#allocation5 + $0x8] sm:$0xff]  ;;  %v428_v37 = vshrl.u32 %v427_v36, 7  ;;  %v455_v39 = vand.u32 127, %v427_v36  ;;  %s679_s5 = sshll.u32 %s988_s30, 4  ;;  %s680_s5 = int_to_ptr.vmem [resolvable:$true] %s679_s5 }
  0x39   :  { %758 = vmatprep.mubr.msk.f32.mxu1 %vm74_vm0, %v61_v6  ;;  %849 = vrot.lane.b32.xlu0 %v1066_v3, %s985_s25  ;;  %v1082_v20 = vld [vmem:[%s1125_s3] ss:$0 sm:$0xff]  ;;  %vm822_vm1 = vmpackc.low %vm74_vm0, %vm74_vm0  ;;  %s987_s3 = smov 32   ;;  %s952_s6 = scalar_lea.vmem %s680_s5, 256 }
  0x3a   :  { %798 = vmatprep.subr.bf16.mxu0 %v797_v5  ;;  %859 = vrot.lane.b32.xlu1 %v1066_v3, %s986_s29  ;;  %v429_v38 = vadd.s32 8, %v428_v37  ;;  %v460_v41 = vand.u32 1, %v455_v39  ;;  %v434_v42 = vand.u32 1, %v428_v37  ;;  %p953_p10 = scmp.ne.s32.totalorder %s680_s5, %s952_s6  ;;  %p957_p11 = scmp.lt.s32.totalorder %s680_s5, %s680_s5 }
  0x3b   :  { %800 = vmatpush3.bf16.msra.mxu0 %v797_v5  ;;  %p958_p12 = scmp.lt.s32.totalorder %s952_s6, %s952_s6 }
  0x3c   :  { %802 = vmatprep.subr.bf16.mxu0 %v801_v7  ;;  %v441_v40 = vand.u32 1, %v429_v38  ;;  %vm468_vm3 = vcmp.eq.s32.totalorder %v434_v42, %v460_v41 }
  0x3d   :  { %854 = vrot.lane.b32.xlu0 %v1071_v9, %s985_s25  ;;  %p959_p13 = por %p958_p12, %p957_p11 }
  0x3e   :  { %864 = vrot.lane.b32.xlu1 %v1071_v9, %s986_s29  ;;  %vm469_vm2 = vcmp.eq.s32.totalorder %v441_v40, %v460_v41 }
  0x3f   :  { %804 = vmatpush3.bf16.msra.mxu0 %v801_v7  ;;  %p960_p0 = pnand %p959_p13, %p953_p10 }
  0x42   :  { %748 = vmatmul.mubr.msk.f32.vlgmr.msra.gmra.mrb[0].mxu0 %vm74_vm0, %v60_v10 }
  0x43   :  { %769 = vmatprep.mubr.msk.f32.mxu0 %vm74_vm0, %v61_v6 }
  0xab   :  { %v850_v11 = vpop.permute.xlu0 %849 }
  0xac   :  { %v852_v12 = vunpack.i.h.bf16 %v850_v11  ;;  %v851_v13 = vunpack.i.l.bf16 %v850_v11  ;;  %v860_v28 = vpop.permute.xlu1 %859 }
  0xad   :  { %v862_v29 = vunpack.i.h.bf16 %v860_v28  ;;  %v861_v30 = vunpack.i.l.bf16 %v860_v28 }
  0xae   :  { %v805_v14 = vpack.c.bf16 %v852_v12, %v851_v13 }
  0xaf   :  { %v855_v15 = vpop.permute.xlu0 %854  ;;  %v813_v31 = vpack.c.bf16 %v862_v29, %v861_v30 }
  0xb0   :  { %v857_v16 = vunpack.i.h.bf16 %v855_v15  ;;  %v856_v17 = vunpack.i.l.bf16 %v855_v15  ;;  %806 = vmatprep.subr.bf16.mxu1 %v805_v14  ;;  %v865_v32 = vpop.permute.xlu1 %864 }
  0xb1   :  { %808 = vmatpush3.bf16.msra.mxu1 %v805_v14  ;;  %v867_v33 = vunpack.i.h.bf16 %v865_v32  ;;  %v866_v34 = vunpack.i.l.bf16 %v865_v32  ;;  %814 = vmatprep.subr.bf16.mxu0 %v813_v31 }
  0xb2   :  { %v809_v18 = vpack.c.bf16 %v857_v16, %v856_v17  ;;  %816 = vmatpush3.bf16.msra.mxu0 %v813_v31 }
  0xb3   :  { %v817_v35 = vpack.c.bf16 %v867_v33, %v866_v34 }
  0xb4   :  { %810 = vmatprep.subr.bf16.mxu1 %v809_v18 }
  0xb5   :  { %812 = vmatpush3.bf16.msra.mxu1 %v809_v18  ;;  %818 = vmatprep.subr.bf16.mxu0 %v817_v35 }
  0xb6   :  { %820 = vmatpush3.bf16.msra.mxu0 %v817_v35 }
  0xb8   :  { %759 = vmatmul.mubr.msk.f32.vlgmr.msra.gmra.mrb[0].mxu1 %vm74_vm0, %v62_v19 }
  0xb9   :  { %770 = vmatmul.mubr.msk.f32.vlgmr.msra.gmra.mrb[2].mxu0 %vm74_vm0, %v62_v19 }
 0x115   :  { %v749_v21 = vpop.f32.mrb[0].mxu0 }
 0x116   :  { %v147_v22 = vpop.f32.mrb[1].mxu0  ;;  %v153_v27 = vadd.f32 %v749_v21, %v1082_v20 }
 0x117   :  { %v148_v23 = vadd.f32 %v1082_v20, %v147_v22 }
 0x119   :  { %776 = vmatprep.mubr.msk.f32.mxu1 %vm74_vm0, %v148_v23 }
 0x18b   :  { %v760_v24 = vpop.f32.mrb[0].mxu1 }
 0x18c   :  { %v244_v25 = vpop.f32.mrb[1].mxu1  ;;  %v771_v59 = vpop.f32.mrb[2].mxu0 }
 0x18d   :  { %v821_v26 = vpack.c.bf16 %v760_v24, %v244_v25  ;;  %v331_v60 = vpop.f32.mrb[3].mxu0 }
 0x18e   :  { %v827_v61 = vpack.c.bf16 %v771_v59, %v331_v60 }
 0x18f   :  { %823 = vmatprep.subr.msk.bf16.mxu1 %vm822_vm1, %v821_v26 }
 0x190   :  { %826 = vmatpush3.bf16.xpose.msk.msra.mxu1 %vm822_vm1, %v821_v26  ;;  %828 = vmatprep.subr.bf16.mxu0 %v827_v61 }
 0x191   :  { %830 = vmatpush3.bf16.msra.mxu0 %v827_v61 }
 0x197   :  { %777 = vmatmul.mubr.msk.f32.vlgmr.msra.gmra.mrb[2].mxu1 %vm74_vm0, %v153_v27 }
 0x26a   :  { %v778_v43 = vpop.f32.mrb[2].mxu1 }
 0x26b   :  { %v471_v44 = vsel %vm469_vm2, %v778_v43, -1e+30  ;;  %v418_v45 = vpop.f32.mrb[3].mxu1 }
 0x26c   :  { %v470_v46 = vsel %vm468_vm3, %v418_v45, -1e+30  ;;  %v476_v47 = vsel %vm472_vm4, %v471_v44, -inf }
 0x26d   :  { %477 = vmax.xlane.f32.xlu1 %v476_v47  ;;  %v473_v48 = vsel %vm472_vm4, %v470_v46, -inf }
 0x26e   :  { %474 = vmax.xlane.f32.xlu0 %v473_v48 }
 0x27e   :  { %869 = vrot.lane.b32.xlu1 %v1066_v3, %s987_s3 }
 0x282   :  { %588 = vrot.lane.b32.xlu1 %v1082_v20, %s985_s25 }
 0x2fa   :  { %v478_v49 = vpop.xlane.xlu1 %477 }
 0x2fb   :  { %v480_v50 = vsub.f32 %v471_v44, %v478_v49  ;;  %v475_v51 = vpop.xlane.xlu0 %474 }
 0x2fc   :  { %v479_v52 = vsub.f32 %v470_v46, %v475_v51 }
 0x2fd   :  { %v483_v53 = vmul.f32 1.442695, %v480_v50 }
 0x2fe   :  { %v481_v54 = vmul.f32 1.442695, %v479_v52  ;;  %v870_v0 = vpop.permute.xlu1 %869 }
 0x2ff   :  { %v872_v1 = vunpack.i.h.bf16 %v870_v0  ;;  %v871_v2 = vunpack.i.l.bf16 %v870_v0 }
 0x300   :  { %878 = vpow2.f32 %v481_v54 }
 0x301   :  { %880 = vpow2.f32 %v483_v53  ;;  %v831_v5 = vpack.c.bf16 %v872_v1, %v871_v2 }
 0x302   :  { %v589_v14 = vpop.permute.xlu1 %588 }
 0x303   :  { %832 = vmatprep.subr.bf16.mxu1 %v831_v5 }
 0x304   :  { %834 = vmatpush3.bf16.msra.mxu1 %v831_v5 }
 0x30a   :  { %v879_v55 = vpop.eup %878 }
 0x30b   :  { %v485_v56 = vsel %vm472_vm4, %v879_v55, 0.0  ;;  %v881_v57 = vpop.eup %880 }
 0x30c   :  { %486 = vadd.xlane.f32.xlu0 %v485_v56  ;;  %v488_v58 = vsel %vm472_vm4, %v881_v57, 0.0 }
 0x310   :  { %489 = vadd.xlane.f32.xlu0 %v488_v58 }
 0x326   :  { %874 = vrot.lane.b32.xlu0 %v1071_v9, %s987_s3 }
 0x399   :  { %v487_v62 = vpop.xlane.xlu0 %486 }
 0x39a   :  { %882 = vrcp.f32 %v487_v62 }
 0x39d   :  { %v490_v63 = vpop.xlane.xlu0 %489 }
 0x39e   :  { %884 = vrcp.f32 %v490_v63 }
 0x3a1   :  { %v875_v4 = vpop.permute.xlu0 %874 }
 0x3a2   :  { %v877_v6 = vunpack.i.h.bf16 %v875_v4  ;;  %v876_v7 = vunpack.i.l.bf16 %v875_v4 }
 0x3a4   :  { %v883_v8 = vpop.eup %882  ;;  %v835_v10 = vpack.c.bf16 %v877_v6, %v876_v7 }
 0x3a5   :  { %v493_v3 = vmul.f32 %v883_v8, %v879_v55 }
 0x3a6   :  { %836 = vmatprep.subr.bf16.mxu1 %v835_v10 }
 0x3a7   :  { %783 = vmatprep.mubr.msk.f32.mxu0 %vm472_vm4, %v493_v3  ;;  %838 = vmatpush3.bf16.msra.mxu1 %v835_v10 }
 0x3a8   :  { %v885_v9 = vpop.eup %884 }
 0x3a9   :  { %v494_v11 = vmul.f32 %v885_v9, %v881_v57 }
 0x3ab   :  { %784 = vmatmul.mubr.msk.f32.vlgmr.msra.gmra.mrb[4].mxu0 %vm472_vm4, %v494_v11 }
 0x47e   :  { %v785_v12 = vpop.f32.mrb[4].mxu0 }
 0x47f   :  { %v567_v13 = vpop.f32.mrb[5].mxu0 }
 0x480   :  { %794 = vmatprep.mubr.msk.f32.mxu1 %vm74_vm0, %v567_v13 }
 0x481   :  { %795 = vmatmul.mubr.msk.f32.vlgmr.msra.gmra.mrb[4].mxu1 %vm74_vm0, %v785_v12 }
 0x554   :  { %v796_v15 = vpop.f32.mrb[4].mxu1 }
 0x555   :  { %v669_v16 = vadd.f32 %v796_v15, %v589_v14  ;;  %v663_v17 = vpop.f32.mrb[5].mxu1 }
 0x556   :  { %v664_v18 = vadd.f32 %v663_v17, %v589_v14 }
 0x557   :  { %673 = vst.msk [vmem:[#allocation8 + $0x8] sm:$0xff] %vm74_vm0, %v669_v16 }
 0x558   :  { %672 = vst.msk [vmem:[#allocation8] sm:$0xff] %vm74_vm0, %v664_v18 }
 0x559   :  { %963 = shalt.err (!%p960_p0)
}
 0x55a   :  { %s964_s9 = scalar_lea.hbm %s1126_s4, 256 }
 0x55b   :  { %p965_p1 = scmp.ne.s32.totalorder %s1126_s4, %s964_s9  ;;  %p968_p2 = scmp.lt.u32.totalorder %s964_s9, %s1126_s4 }
 0x55d   :  { %p970_p3 = pnand %p968_p2, %p965_p1 }
 0x55f   :  { %973 = shalt.err (!%p970_p3)
}
 0x560   :  { %685 = dma.vmem_to_hbm [thread:$0]  %s680_s5, 256, %s1126_s4, [#allocation4], %s982_s27, %s982_s27, %s983_s28  }
 0x561   :  { %978 = dma.done.wait [#allocation4], 256  }
 0x562   :  { %979 = vsyncadd [#allocation4], 4294967040 }
 0x563   :  { %689 = vsyncpa [#allocation3], 1 }
 0x564   :  { %690 = vsyncpa [#allocation6], 1 }
 0x565   :  { %691 = vsyncpa [#allocation4], 1 }

</bundles_post_ra>
